<compile_context>
chip_gen: v5e
topology: v5e:2x2
jax: 0.10.0
libtpu: 0.0.40
codegen_flags: <defaults>
</compile_context>

<pallas_src>
import itertools

import numpy as np
import jax
import jax.numpy as jnp
from jax.experimental import pallas as pl
from jax.experimental.pallas import tpu as pltpu

_BIG = 1.0e30   # Python float literal (NOT a jnp scalar) -> not a captured kernel constant


def _argmin_match(dist, valid, col, num_cols, thr_scalar=None, thr_row=None):
    """Per pred row: first-index argmin over valid gt lanes, then threshold test.
    dist: (Q, M) f32.  valid / col / thr_row: (1, M) (broadcast).  Returns (Q, 1) int32
    holding the matched gt index or -1."""
    d = jnp.where(valid, dist, _BIG)
    min_d = jnp.min(d, axis=1, keepdims=True)                              # (Q,1)  XLU
    # first column attaining the minimum (torch.min tie semantics)
    min_idx = jnp.min(jnp.where(d <= min_d, col, num_cols),
                      axis=1, keepdims=True)                               # (Q,1)  XLU
    if thr_row is not None:
        thr = jnp.min(jnp.where(col == min_idx, thr_row, _BIG),
                      axis=1, keepdims=True)                               # thr[min_idx]
    else:
        thr = thr_scalar                                                   # scalar: no XLU
    matched = (min_d <= thr) & (min_d < _BIG)                              # guard: no gts
    return jnp.where(matched, min_idx, -1).astype(jnp.int32)


def _make_matcher_kernel(b_tile):
    def kernel(sizes_ref, wh_ref, mind_ref,        # SMEM scalar prefetch
               rp_ref, pred_ref, gtT_ref,          # VMEM (B,Q,2) (B,Q,4) (B,4,M)
               cost_ref, match_ref):               # out  (B,Q,M) f32, (B,2,Q) i32
        _, q, m = cost_ref.shape
        col = jax.lax.broadcasted_iota(jnp.int32, (1, m), 1)  # (1,M): keep mask/index 1-row
        min_dist = mind_ref[0]

        for b in range(b_tile):                                # short, fully unrolled
            i = pl.program_id(0) * b_tile + b                  # global batch index
            size_i = sizes_ref[i]
            w_img = wh_ref[i, 0]
            h_img = wh_ref[i, 1]
            valid = col < size_i                               # (1,M) mask padded gt lanes

            gt = gtT_ref[b]                                    # (4, M)
            gt_cx, gt_cy, gt_w, gt_h = gt[0:1, :], gt[1:2, :], gt[2:3, :], gt[3:4, :]
            rp = rp_ref[b]                                     # (Q, 2)
            pb = pred_ref[b]                                   # (Q, 4)

            # ---- reference-point L2 cost (torch.cdist p=2) + 'reference' match ----
            dxr = rp[:, 0:1] - gt_cx                           # (Q, M)   VPU
            dyr = rp[:, 1:2] - gt_cy
            ref_dist = jnp.sqrt(dxr * dxr + dyr * dyr)         # EUP sqrt (needed for Hungarian)
            cost_ref[b] = ref_dist                             # lane-dense unmasked store
            # scalar threshold: exact torch semantics, no threshold-gather reduction
            ref_idx = _argmin_match(ref_dist, valid, col, m, thr_scalar=min_dist)

            # ---- 'center' match: squared distances vs squared per-gt thresholds ----
            dxc = (pb[:, 0:1] - gt_cx) * w_img
            dyc = (pb[:, 1:2] - gt_cy) * h_img
            ctr_sq = dxc * dxc + dyc * dyc
            wb = gt_w * w_img
            hb = gt_h * h_img
            min_thr = 100.0 * h_img / 2866.0
            # max of squares == square of max (all operands non-negative)
            thr_sq = jnp.maximum(min_thr * min_thr, (wb * wb + hb * hb) * 0.25)   # (1, M)
            ctr_idx = _argmin_match(ctr_sq, valid, col, m, thr_row=thr_sq)

            # pack both (Q,1) results -> one lane-dense (2,Q) store (single small XLU transpose)
            sel = jax.lax.broadcasted_iota(jnp.int32, (q, 2), 1)
            match_ref[b] = jnp.where(sel == 0, ref_idx, ctr_idx).T            # (2, Q)
    return kernel


def _pick_b_tile(bs):
    # amortize per-step overhead, but keep >= 2 "parallel" grid steps so both v7x TCs get work
    for bt in (4, 2):
        if bs % bt == 0 and bs // bt >= 2:
            return bt
    return 1
    # TODO(synk): for bs == 1 on v7x, a second "parallel" grid axis splitting Q would occupy
    # both TensorCores; unnecessary at demo sizes.


@jax.jit
def fused_reference_match(sizes, wh, min_dist, ref_pts, pred_boxes, gtT):
    """sizes (bs,) i32; wh (bs,2)=[w,h] f32; min_dist (1,) f32; ref_pts (bs,Q,2);
    pred_boxes (bs,Q,4); gtT (bs,4,MAX_GT) padded & transposed gt boxes (cxcywh)."""
    bs, q, _ = ref_pts.shape
    m = gtT.shape[2]
    b_tile = _pick_b_tile(bs)
    grid_spec = pltpu.PrefetchScalarGridSpec(
        num_scalar_prefetch=3,
        grid=(bs // b_tile,),
        in_specs=[
            pl.BlockSpec((b_tile, q, 2), lambda i, *_: (i, 0, 0)),
            pl.BlockSpec((b_tile, q, 4), lambda i, *_: (i, 0, 0)),
            pl.BlockSpec((b_tile, 4, m), lambda i, *_: (i, 0, 0)),
        ],
        out_specs=[
            pl.BlockSpec((b_tile, q, m), lambda i, *_: (i, 0, 0)),
            pl.BlockSpec((b_tile, 2, q), lambda i, *_: (i, 0, 0)),
        ],
    )
    return pl.pallas_call(
        _make_matcher_kernel(b_tile),
        grid_spec=grid_spec,
        out_shape=[
            jax.ShapeDtypeStruct((bs, q, m), jnp.float32),
            jax.ShapeDtypeStruct((bs, 2, q), jnp.int32),
        ],
        compiler_params=pltpu.CompilerParams(
            dimension_semantics=("parallel",)),
    )(sizes, wh, min_dist, ref_pts, pred_boxes, gtT)


# ----------------------------------------------------------------------------
# Hungarian assignment (host-side glue).
# ----------------------------------------------------------------------------
def _linear_sum_assignment_small(cost):
    # TODO(synk): scipy.optimize.linear_sum_assignment has no Pallas equivalent; exact
    # brute-force solver (factorial) — valid only for the tiny demo cost matrices.
    cost = np.asarray(cost, dtype=np.float64)
    n_rows, n_cols = cost.shape
    if n_cols > n_rows:
        cols, rows = _linear_sum_assignment_small(cost.T)
        order = np.argsort(rows)
        return rows[order], cols[order]
    best_rows, best_cost = None, np.inf
    for rows in itertools.permutations(range(n_rows), n_cols):
        c = cost[list(rows), list(range(n_cols))].sum()
        if c < best_cost:
            best_cost, best_rows = c, rows
    row_ind = np.asarray(best_rows, dtype=np.int64)
    col_ind = np.arange(n_cols, dtype=np.int64)
    order = np.argsort(row_ind)
    return row_ind[order], col_ind[order]


# ----------------------------------------------------------------------------
# ReferenceMatcher forward (no learnable parameters).
# ----------------------------------------------------------------------------
class ReferenceMatcher:
    def __init__(self, distance=0.1, distance_function='center'):
        self.distance = distance
        self.matcher_type = 'reference'
        self.distance_function = distance_function
        # TODO(synk): 'iou' distance_function branch (box_iou) not ported; demo uses 'center'.

    def forward(self, outputs, targets, reference_points):
        bs, num_queries, _ = reference_points.shape
        sizes = [int(t['boxes'].shape[0]) for t in targets]
        # lane-dense gt padding (fixed shape -> one compile, unmasked vst on the cost output)
        max_gt = max(128, -(-max(max(sizes), 1) // 128) * 128)

        gtT = np.zeros((bs, 4, max_gt), dtype=np.float32)     # gt boxes transposed + padded
        wh = np.ones((bs, 2), dtype=np.float32)               # (w_img, h_img) per batch item
        for i, t in enumerate(targets):
            if sizes[i] > 0:
                gtT[i, :, :sizes[i]] = np.asarray(t['boxes'], dtype=np.float32).T
            h_img, w_img = np.asarray(t['orig_size'], dtype=np.float32)
            wh[i, 0] = w_img
            wh[i, 1] = h_img

        cost, match = fused_reference_match(
            jnp.asarray(sizes, dtype=jnp.int32),
            jnp.asarray(wh),
            jnp.asarray([self.distance], dtype=jnp.float32),
            reference_points.astype(jnp.float32),
            outputs['pred_boxes'].astype(jnp.float32),
            jnp.asarray(gtT),
        )
        # Single device -> host transfer; everything below is numpy/python glue.
        cost, match = jax.device_get(jax.block_until_ready((cost, match)))
        ref_match = match[:, 0, :]
        ctr_match = match[:, 1, :]
        self.last_cost = cost                       # stashed for the __main__ numeric check
        self.last_ref_match = ref_match
        self.last_ctr_match = ctr_match

        new_match, duplicate_match = [], []
        for i in range(bs):
            if sizes[i] == 0:
                new_match.append((np.asarray([], np.int64), np.asarray([], np.int64)))
                duplicate_match.append((np.asarray([], np.int64), np.asarray([], np.int64)))
                continue

            c_i = cost[i, :, :sizes[i]]                       # (num_queries, size_i) true L2
            hun_pred_idx, hun_gt_idx = _linear_sum_assignment_small(c_i)
            match_idx_dict = {int(hun_pred_idx[j]): int(hun_gt_idx[j])
                              for j in range(len(hun_pred_idx))}
            dup_match_idx_dict = {}

            for j in range(num_queries):
                if ref_match[i, j] != -1 and j not in match_idx_dict:
                    match_idx_dict[j] = int(ref_match[i, j])
                if j not in match_idx_dict and ctr_match[i, j] != -1:
                    dup_match_idx_dict[j] = int(ctr_match[i, j])

            new_match.append((np.asarray(list(match_idx_dict.keys()), np.int64),
                              np.asarray(list(match_idx_dict.values()), np.int64)))
            duplicate_match.append((np.asarray(list(dup_match_idx_dict.keys()), np.int64),
                                    np.asarray(list(dup_match_idx_dict.values()), np.int64)))

        self.duplicate_match = duplicate_match
        return new_match


if __name__ == "__main__":
    key = jax.random.PRNGKey(0)
    bs, num_queries = 2, 8
    k1, k2, k3 = jax.random.split(key, 3)

    reference_points = jax.random.uniform(k1, (bs, num_queries, 2), dtype=jnp.float32)
    pred_boxes = jax.random.uniform(k2, (bs, num_queries, 4), dtype=jnp.float32) * 0.5 + 0.25

    sizes = [3, 2]
    tkeys = jax.random.split(k3, bs)
    targets = []
    for i in range(bs):
        boxes = jax.random.uniform(tkeys[i], (sizes[i], 4), dtype=jnp.float32) * 0.5 + 0.25
        targets.append({
            'boxes': boxes,                                            # (M_i, 4) cxcywh
            'orig_size': jnp.array([480.0, 640.0], dtype=jnp.float32), # (h, w)
        })
    outputs = {'pred_boxes': pred_boxes}

    matcher = ReferenceMatcher(distance=0.1, distance_function='center')
    new_match = matcher.forward(outputs, targets, reference_points)

    # ---- lightweight numpy reference check of the kernel outputs ----
    rp_np = np.asarray(reference_points, np.float32)
    pb_np = np.asarray(pred_boxes, np.float32)
    for i in range(bs):
        gt = np.asarray(targets[i]['boxes'], np.float32)
        h_img, w_img = np.asarray(targets[i]['orig_size'], np.float32)
        # torch.cdist(p=2) cost
        d_ref = np.sqrt(((rp_np[i][:, None, :] - gt[None, :, :2]) ** 2).sum(-1))
        np.testing.assert_allclose(matcher.last_cost[i, :, :sizes[i]], d_ref,
                                   rtol=1e-5, atol=1e-5)
        # 'reference' distance match
        mi = d_ref.argmin(1)
        dmin = d_ref[np.arange(num_queries), mi]
        exp_ref = np.where(dmin <= matcher.distance, mi, -1)
        tie = np.isclose(dmin, matcher.distance, rtol=1e-4, atol=1e-6)
        assert np.all((matcher.last_ref_match[i] == exp_ref) | tie)
        # 'center' distance match
        dx = (pb_np[i][:, None, 0] - gt[None, :, 0]) * w_img
        dy = (pb_np[i][:, None, 1] - gt[None, :, 1]) * h_img
        dc = np.sqrt(dx * dx + dy * dy)
        thr = np.maximum(100.0 * h_img / 2866.0,
                         np.sqrt((gt[:, 2] * w_img) ** 2 + (gt[:, 3] * h_img) ** 2) / 2.0)
        mj = dc.argmin(1)
        dcmin = dc[np.arange(num_queries), mj]
        exp_ctr = np.where(dcmin <= thr[mj], mj, -1)
        tie = np.isclose(dcmin, thr[mj], rtol=1e-4, atol=1e-6)
        assert np.all((matcher.last_ctr_match[i] == exp_ctr) | tie)

    for (pi, gi) in new_match:
        assert pi.shape == gi.shape and pi.dtype == np.int64
        assert np.all(pi < num_queries)
    for i, (pi, gi) in enumerate(matcher.duplicate_match):
        assert pi.shape == gi.shape
        if gi.size:
            assert np.all(gi < sizes[i])

    print("KERNEL_OK")
</pallas_src>

<mosaic_0001>
module attributes {stable_mosaic.version = 11 : i64} {
  func.func @kernel(%arg0: i32, %arg1: memref<2xi32, #tpu.memory_space<smem>>, %arg2: memref<2x2xf32, #tpu.memory_space<smem>>, %arg3: memref<1xf32, #tpu.memory_space<smem>>, %arg4: memref<1x8x2xf32, #tpu.memory_space<vmem>>, %arg5: memref<1x8x4xf32, #tpu.memory_space<vmem>>, %arg6: memref<1x4x128xf32, #tpu.memory_space<vmem>>, %arg7: memref<1x8x128xf32, #tpu.memory_space<vmem>>, %arg8: memref<1x2x8xi32, #tpu.memory_space<vmem>>) attributes {dimension_semantics = [#tpu.dimension_semantics<parallel>], iteration_bounds = array<i64: 2>, scalar_prefetch = 3 : i64, scratch_operands = 0 : i64, tpu.core_type = #tpu.core_type<tc>, window_params = [{transform_indices = @transform_0, window_bounds = array<i64: 1, 8, 2>}, {transform_indices = @transform_1, window_bounds = array<i64: 1, 8, 4>}, {transform_indices = @transform_2, window_bounds = array<i64: 1, 4, 128>}, {transform_indices = @transform_3, window_bounds = array<i64: 1, 8, 128>}, {transform_indices = @transform_4, window_bounds = array<i64: 1, 2, 8>}]} {
    %0 = tpu.iota {dimensions = array<i32: 1>} : vector<1x128xi32>
    %c0 = arith.constant 0 : index
    %1 = memref.load %arg3[%c0] : memref<1xf32, #tpu.memory_space<smem>>
    %c1_i32 = arith.constant 1 : i32
    %2 = arith.muli %arg0, %c1_i32 : i32
    %c0_i32 = arith.constant 0 : i32
    %3 = arith.addi %2, %c0_i32 : i32
    %4 = arith.index_cast %3 : i32 to index
    %5 = memref.load %arg1[%4] : memref<2xi32, #tpu.memory_space<smem>>
    %6 = arith.index_cast %3 : i32 to index
    %c0_0 = arith.constant 0 : index
    %7 = memref.load %arg2[%6, %c0_0] : memref<2x2xf32, #tpu.memory_space<smem>>
    %8 = arith.index_cast %3 : i32 to index
    %c1 = arith.constant 1 : index
    %9 = memref.load %arg2[%8, %c1] : memref<2x2xf32, #tpu.memory_space<smem>>
    %10 = vector.broadcast %5 : i32 to vector<1x128xi32>
    %11 = arith.cmpi slt, %0, %10 : vector<1x128xi32>
    %c0_1 = arith.constant 0 : index
    %c0_2 = arith.constant 0 : index
    %c0_3 = arith.constant 0 : index
    %12 = vector.load %arg6[%c0_1, %c0_2, %c0_3] : memref<1x4x128xf32, #tpu.memory_space<vmem>>, vector<1x4x128xf32>
    %13 = vector.shape_cast %12 : vector<1x4x128xf32> to vector<4x128xf32>
    %14 = vector.extract_strided_slice %13 {offsets = [0, 0], sizes = [1, 128], strides = [1, 1]} : vector<4x128xf32> to vector<1x128xf32>
    %15 = vector.extract_strided_slice %13 {offsets = [1, 0], sizes = [1, 128], strides = [1, 1]} : vector<4x128xf32> to vector<1x128xf32>
    %16 = vector.extract_strided_slice %13 {offsets = [2, 0], sizes = [1, 128], strides = [1, 1]} : vector<4x128xf32> to vector<1x128xf32>
    %17 = vector.extract_strided_slice %13 {offsets = [3, 0], sizes = [1, 128], strides = [1, 1]} : vector<4x128xf32> to vector<1x128xf32>
    %c0_4 = arith.constant 0 : index
    %c0_5 = arith.constant 0 : index
    %c0_6 = arith.constant 0 : index
    %18 = vector.load %arg4[%c0_4, %c0_5, %c0_6] : memref<1x8x2xf32, #tpu.memory_space<vmem>>, vector<1x8x2xf32>
    %19 = vector.shape_cast %18 : vector<1x8x2xf32> to vector<8x2xf32>
    %c0_7 = arith.constant 0 : index
    %c0_8 = arith.constant 0 : index
    %c0_9 = arith.constant 0 : index
    %20 = vector.load %arg5[%c0_7, %c0_8, %c0_9] : memref<1x8x4xf32, #tpu.memory_space<vmem>>, vector<1x8x4xf32>
    %21 = vector.shape_cast %20 : vector<1x8x4xf32> to vector<8x4xf32>
    %22 = vector.extract_strided_slice %19 {offsets = [0, 0], sizes = [8, 1], strides = [1, 1]} : vector<8x2xf32> to vector<8x1xf32>
    %23 = vector.broadcast %22 : vector<8x1xf32> to vector<8x128xf32>
    %24 = vector.broadcast %14 : vector<1x128xf32> to vector<8x128xf32>
    %25 = arith.subf %23, %24 : vector<8x128xf32>
    %26 = vector.extract_strided_slice %19 {offsets = [0, 1], sizes = [8, 1], strides = [1, 1]} : vector<8x2xf32> to vector<8x1xf32>
    %27 = vector.broadcast %26 : vector<8x1xf32> to vector<8x128xf32>
    %28 = vector.broadcast %15 : vector<1x128xf32> to vector<8x128xf32>
    %29 = arith.subf %27, %28 : vector<8x128xf32>
    %30 = arith.mulf %25, %25 : vector<8x128xf32>
    %31 = arith.mulf %29, %29 : vector<8x128xf32>
    %32 = arith.addf %30, %31 : vector<8x128xf32>
    %33 = math.sqrt %32 : vector<8x128xf32>
    %c0_10 = arith.constant 0 : index
    %c0_11 = arith.constant 0 : index
    %c0_12 = arith.constant 0 : index
    %34 = vector.load %arg7[%c0_10, %c0_11, %c0_12] : memref<1x8x128xf32, #tpu.memory_space<vmem>>, vector<1x8x128xf32>
    %35 = vector.shape_cast %34 : vector<1x8x128xf32> to vector<8x128xf32>
    %36 = vector.shape_cast %33 : vector<8x128xf32> to vector<1x8x128xf32>
    tpu.vector_store %arg7[%c0_10, %c0_11, %c0_12], %36 {strides = array<i32>} : memref<1x8x128xf32, #tpu.memory_space<vmem>>, vector<1x8x128xf32>,
    %cst = arith.constant 1.000000e+30 : f32
    %37 = vector.shape_cast %11 : vector<1x128xi1> to vector<1x128xi1>
    %38 = vector.broadcast %37 : vector<1x128xi1> to vector<8x128xi1>
    %39 = vector.broadcast %cst : f32 to vector<8x128xf32>
    %40 = arith.select %38, %33, %39 : vector<8x128xi1>, vector<8x128xf32>
    %cst_13 = arith.constant dense<0x7F800000> : vector<8xf32>
    %41 = vector.multi_reduction <minimumf>, %40, %cst_13 [1] : vector<8x128xf32> to vector<8xf32>
    %42 = vector.shape_cast %41 : vector<8xf32> to vector<8x1xf32>
    %43 = vector.broadcast %42 : vector<8x1xf32> to vector<8x128xf32>
    %44 = arith.cmpf ole, %40, %43 : vector<8x128xf32>
    %c128_i32 = arith.constant 128 : i32
    %45 = vector.shape_cast %0 : vector<1x128xi32> to vector<1x128xi32>
    %46 = vector.broadcast %45 : vector<1x128xi32> to vector<8x128xi32>
    %47 = vector.broadcast %c128_i32 : i32 to vector<8x128xi32>
    %48 = arith.select %44, %46, %47 : vector<8x128xi1>, vector<8x128xi32>
    %cst_14 = arith.constant dense<2147483647> : vector<8xi32>
    %49 = vector.multi_reduction <minsi>, %48, %cst_14 [1] : vector<8x128xi32> to vector<8xi32>
    %50 = vector.shape_cast %49 : vector<8xi32> to vector<8x1xi32>
    %51 = vector.broadcast %1 : f32 to vector<8x1xf32>
    %52 = arith.cmpf ole, %42, %51 : vector<8x1xf32>
    %cst_15 = arith.constant 1.000000e+30 : f32
    %53 = vector.broadcast %cst_15 : f32 to vector<8x1xf32>
    %54 = arith.cmpf olt, %42, %53 : vector<8x1xf32>
    %55 = arith.andi %52, %54 : vector<8x1xi1>
    %c-1_i32 = arith.constant -1 : i32
    %56 = vector.broadcast %c-1_i32 : i32 to vector<8x1xi32>
    %57 = arith.select %55, %50, %56 : vector<8x1xi1>, vector<8x1xi32>
    %58 = vector.extract_strided_slice %21 {offsets = [0, 0], sizes = [8, 1], strides = [1, 1]} : vector<8x4xf32> to vector<8x1xf32>
    %59 = vector.broadcast %58 : vector<8x1xf32> to vector<8x128xf32>
    %60 = vector.broadcast %14 : vector<1x128xf32> to vector<8x128xf32>
    %61 = arith.subf %59, %60 : vector<8x128xf32>
    %62 = vector.broadcast %7 : f32 to vector<8x128xf32>
    %63 = arith.mulf %61, %62 : vector<8x128xf32>
    %64 = vector.extract_strided_slice %21 {offsets = [0, 1], sizes = [8, 1], strides = [1, 1]} : vector<8x4xf32> to vector<8x1xf32>
    %65 = vector.broadcast %64 : vector<8x1xf32> to vector<8x128xf32>
    %66 = vector.broadcast %15 : vector<1x128xf32> to vector<8x128xf32>
    %67 = arith.subf %65, %66 : vector<8x128xf32>
    %68 = vector.broadcast %9 : f32 to vector<8x128xf32>
    %69 = arith.mulf %67, %68 : vector<8x128xf32>
    %70 = arith.mulf %63, %63 : vector<8x128xf32>
    %71 = arith.mulf %69, %69 : vector<8x128xf32>
    %72 = arith.addf %70, %71 : vector<8x128xf32>
    %73 = vector.broadcast %7 : f32 to vector<1x128xf32>
    %74 = arith.mulf %16, %73 : vector<1x128xf32>
    %75 = vector.broadcast %9 : f32 to vector<1x128xf32>
    %76 = arith.mulf %17, %75 : vector<1x128xf32>
    %cst_16 = arith.constant 1.000000e+02 : f32
    %77 = arith.mulf %cst_16, %9 : f32
    %cst_17 = arith.constant 2.866000e+03 : f32
    %78 = arith.divf %77, %cst_17 : f32
    %79 = arith.mulf %78, %78 : f32
    %80 = arith.mulf %74, %74 : vector<1x128xf32>
    %81 = arith.mulf %76, %76 : vector<1x128xf32>
    %82 = arith.addf %80, %81 : vector<1x128xf32>
    %cst_18 = arith.constant 2.500000e-01 : f32
    %83 = vector.broadcast %cst_18 : f32 to vector<1x128xf32>
    %84 = arith.mulf %82, %83 : vector<1x128xf32>
    %85 = vector.broadcast %79 : f32 to vector<1x128xf32>
    %86 = arith.maximumf %85, %84 : vector<1x128xf32>
    %cst_19 = arith.constant 1.000000e+30 : f32
    %87 = vector.shape_cast %11 : vector<1x128xi1> to vector<1x128xi1>
    %88 = vector.broadcast %87 : vector<1x128xi1> to vector<8x128xi1>
    %89 = vector.broadcast %cst_19 : f32 to vector<8x128xf32>
    %90 = arith.select %88, %72, %89 : vector<8x128xi1>, vector<8x128xf32>
    %cst_20 = arith.constant dense<0x7F800000> : vector<8xf32>
    %91 = vector.multi_reduction <minimumf>, %90, %cst_20 [1] : vector<8x128xf32> to vector<8xf32>
    %92 = vector.shape_cast %91 : vector<8xf32> to vector<8x1xf32>
    %93 = vector.broadcast %92 : vector<8x1xf32> to vector<8x128xf32>
    %94 = arith.cmpf ole, %90, %93 : vector<8x128xf32>
    %c128_i32_21 = arith.constant 128 : i32
    %95 = vector.shape_cast %0 : vector<1x128xi32> to vector<1x128xi32>
    %96 = vector.broadcast %95 : vector<1x128xi32> to vector<8x128xi32>
    %97 = vector.broadcast %c128_i32_21 : i32 to vector<8x128xi32>
    %98 = arith.select %94, %96, %97 : vector<8x128xi1>, vector<8x128xi32>
    %cst_22 = arith.constant dense<2147483647> : vector<8xi32>
    %99 = vector.multi_reduction <minsi>, %98, %cst_22 [1] : vector<8x128xi32> to vector<8xi32>
    %100 = vector.shape_cast %99 : vector<8xi32> to vector<8x1xi32>
    %101 = vector.broadcast %0 : vector<1x128xi32> to vector<8x128xi32>
    %102 = vector.broadcast %100 : vector<8x1xi32> to vector<8x128xi32>
    %103 = arith.cmpi eq, %101, %102 : vector<8x128xi32>
    %cst_23 = arith.constant 1.000000e+30 : f32
    %104 = vector.shape_cast %86 : vector<1x128xf32> to vector<1x128xf32>
    %105 = vector.broadcast %104 : vector<1x128xf32> to vector<8x128xf32>
    %106 = vector.broadcast %cst_23 : f32 to vector<8x128xf32>
    %107 = arith.select %103, %105, %106 : vector<8x128xi1>, vector<8x128xf32>
    %cst_24 = arith.constant dense<0x7F800000> : vector<8xf32>
    %108 = vector.multi_reduction <minimumf>, %107, %cst_24 [1] : vector<8x128xf32> to vector<8xf32>
    %109 = vector.shape_cast %108 : vector<8xf32> to vector<8x1xf32>
    %110 = arith.cmpf ole, %92, %109 : vector<8x1xf32>
    %cst_25 = arith.constant 1.000000e+30 : f32
    %111 = vector.broadcast %cst_25 : f32 to vector<8x1xf32>
    %112 = arith.cmpf olt, %92, %111 : vector<8x1xf32>
    %113 = arith.andi %110, %112 : vector<8x1xi1>
    %c-1_i32_26 = arith.constant -1 : i32
    %114 = vector.broadcast %c-1_i32_26 : i32 to vector<8x1xi32>
    %115 = arith.select %113, %100, %114 : vector<8x1xi1>, vector<8x1xi32>
    %116 = tpu.iota {dimensions = array<i32: 1>} : vector<8x2xi32>
    %c0_i32_27 = arith.constant 0 : i32
    %117 = vector.broadcast %c0_i32_27 : i32 to vector<8x2xi32>
    %118 = arith.cmpi eq, %116, %117 : vector<8x2xi32>
    %119 = vector.shape_cast %57 : vector<8x1xi32> to vector<8x1xi32>
    %120 = vector.broadcast %119 : vector<8x1xi32> to vector<8x2xi32>
    %121 = vector.shape_cast %115 : vector<8x1xi32> to vector<8x1xi32>
    %122 = vector.broadcast %121 : vector<8x1xi32> to vector<8x2xi32>
    %123 = arith.select %118, %120, %122 : vector<8x2xi1>, vector<8x2xi32>
    %124 = tpu.transpose %123, [1, 0] : vector<8x2xi32> -> vector<2x8xi32>
    %c0_28 = arith.constant 0 : index
    %c0_29 = arith.constant 0 : index
    %c0_30 = arith.constant 0 : index
    %125 = vector.load %arg8[%c0_28, %c0_29, %c0_30] : memref<1x2x8xi32, #tpu.memory_space<vmem>>, vector<1x2x8xi32>
    %126 = vector.shape_cast %125 : vector<1x2x8xi32> to vector<2x8xi32>
    %127 = vector.shape_cast %124 : vector<2x8xi32> to vector<1x2x8xi32>
    tpu.vector_store %arg8[%c0_28, %c0_29, %c0_30], %127 {strides = array<i32>} : memref<1x2x8xi32, #tpu.memory_space<vmem>>, vector<1x2x8xi32>,
    return
  }
  func.func @transform_0(%arg0: i32, %arg1: memref<2xi32, #tpu.memory_space<smem>>, %arg2: memref<2x2xf32, #tpu.memory_space<smem>>, %arg3: memref<1xf32, #tpu.memory_space<smem>>) -> (i32, i32, i32) {
    %c0_i32 = arith.constant 0 : i32
    %c0_i32_0 = arith.constant 0 : i32
    %c0_i32_1 = arith.constant 0 : i32
    return %arg0, %c0_i32, %c0_i32_0 : i32, i32, i32
  }
  func.func @transform_1(%arg0: i32, %arg1: memref<2xi32, #tpu.memory_space<smem>>, %arg2: memref<2x2xf32, #tpu.memory_space<smem>>, %arg3: memref<1xf32, #tpu.memory_space<smem>>) -> (i32, i32, i32) {
    %c0_i32 = arith.constant 0 : i32
    %c0_i32_0 = arith.constant 0 : i32
    %c0_i32_1 = arith.constant 0 : i32
    return %arg0, %c0_i32, %c0_i32_0 : i32, i32, i32
  }
  func.func @transform_2(%arg0: i32, %arg1: memref<2xi32, #tpu.memory_space<smem>>, %arg2: memref<2x2xf32, #tpu.memory_space<smem>>, %arg3: memref<1xf32, #tpu.memory_space<smem>>) -> (i32, i32, i32) {
    %c0_i32 = arith.constant 0 : i32
    %c0_i32_0 = arith.constant 0 : i32
    %c0_i32_1 = arith.constant 0 : i32
    return %arg0, %c0_i32, %c0_i32_0 : i32, i32, i32
  }
  func.func @transform_3(%arg0: i32, %arg1: memref<2xi32, #tpu.memory_space<smem>>, %arg2: memref<2x2xf32, #tpu.memory_space<smem>>, %arg3: memref<1xf32, #tpu.memory_space<smem>>) -> (i32, i32, i32) {
    %c0_i32 = arith.constant 0 : i32
    %c0_i32_0 = arith.constant 0 : i32
    %c0_i32_1 = arith.constant 0 : i32
    return %arg0, %c0_i32, %c0_i32_0 : i32, i32, i32
  }
  func.func @transform_4(%arg0: i32, %arg1: memref<2xi32, #tpu.memory_space<smem>>, %arg2: memref<2x2xf32, #tpu.memory_space<smem>>, %arg3: memref<1xf32, #tpu.memory_space<smem>>) -> (i32, i32, i32) {
    %c0_i32 = arith.constant 0 : i32
    %c0_i32_0 = arith.constant 0 : i32
    %c0_i32_1 = arith.constant 0 : i32
    return %arg0, %c0_i32, %c0_i32_0 : i32, i32, i32
  }
}

</mosaic_0001>

<bundles_post_ra>
// kernel: fused_reference_match.1
= control target key start
LH: loop header
LB: loop body
LE: loop exit
PB: predicated region body
PF: predicated region fallthrough
CT: control target
= control target key end

     0   :  { %s775_s30 = smov [#allocation3]   ;;  %s776_s8 = smov [#allocation4]   ;;  %s987_s0 = inlined_call_operand.vmem [shape: s32[2], index: 0, kind: input, shape index: {}]   ;;  %s988_s3 = inlined_call_operand.vmem [shape: f32[2,8,2], index: 3, kind: input, shape index: {}]   ;;  %s989_s4 = inlined_call_operand.vmem [shape: f32[2,8,4], index: 4, kind: input, shape index: {}]   ;;  %s990_s5 = inlined_call_operand.vmem [shape: f32[2,4,128], index: 5, kind: input, shape index: {}]   ;;  %s991_s6 = inlined_call_operand.hbm [shape: f32[2,8,128], index: 6, kind: output, shape index: {0}]   ;;  %s992_s7 = inlined_call_operand.hbm [shape: s32[2,2,8], index: 7, kind: output, shape index: {1}]   ;;  %s993_s1 = inlined_call_operand.vmem [shape: f32[2,2], index: 1, kind: input, shape index: {}]   ;;  %s994_s2 = inlined_call_operand.<no memory space> [shape: f32[1], index: 2, kind: input, shape index: {}]  }
   0x1   :  { %s14_s26 = sshll.u32 %s987_s0, 4  ;;  %s19_s29 = sshll.u32 %s993_s1, 4  ;;  %s15_s26 = int_to_ptr.vmem [resolvable:$true] %s14_s26  ;;  %s20_s29 = int_to_ptr.vmem [resolvable:$true] %s19_s29 }
   0x2   :  { %17 = dma.vmem_to_smem %s15_s26, 16, %s775_s30, [#allocation2] }
   0x3   :  { %22 = dma.vmem_to_smem %s20_s29, 32, %s776_s8, [#allocation2] }
   0x4   :  { %23 = sst [smem:[#allocation5]] %s994_s2 }
   0x5   :  { %749 = dma.done.wait [#allocation2], 48 }
   0x6   :  { %750 = vsyncadd [#allocation2], 4294967248 }
   0x7   :  { %26 = sfence }
   0x8   :  { %27 = vsyncpa [#allocation7], 0 }
   0x9   :  { %29 = vsyncpa [#allocation7 + $0x1], 0 }
   0xa   :  { %30 = vsyncpa [#allocation9], 0 }
   0xb   :  { %32 = vsyncpa [#allocation9 + $0x1], 0  ;;  %s829_s0 = smov 0   ;;  %s831_s1 = smov 0  }
   0xc   :  { %s833_s11 = smov 0   ;;  %s835_s12 = smov 0  }
   0xd LB: > { %s850_s2 = sadd.s32 4294967295, %s773_s12   ;;  %s578_s13 = sadd.s32 4294967294, %s773_s12   ;;  %s773_s12 = sphi %s835_s12, %s1002_s12   ;;  %s769_s11 = sphi %s833_s11, %s1001_s11   ;;  %s765_s1 = sphi %s831_s1, %s1000_s1   ;;  %s761_s0 = sphi %s829_s0, %s999_s0  }
   0xe   : > { %s854_s14 = sadd.s32 1, %s773_s12   ;;  %s123_s15 = sadd.s32 1, %s769_s11 }
   0xf   : > { %s120_s16 = ssub.s32 %s773_s12, %s854_s14  ;;  %p133_p0 = scmp.ne.s32.totalorder %s769_s11, %s765_s1 }
  0x10   : > { %p121_p1 = scmp.eq.s32.totalorder %s120_s16, 0  ;;  %p134_p2 = scmp.eq.s32.totalorder %s850_s2, 1 }
  0x11   : > { %p139_p3 = scmp.ne.s32.totalorder %s765_s1, %s761_s0  ;;  %p140_p4 = scmp.eq.s32.totalorder %s578_s13, 1 }
  0x12   : > { %s865_s17 = scalar_select %p121_p1, %s769_s11, %s123_s15  }
  0x13   : > { %p867_p5 = por %p134_p2, %p133_p0  ;;  %p871_p6 = por %p140_p4, %p139_p3 }
  0x14   : > { %p581_p7 = scmp.ge.s32.totalorder %s773_s12, 1  ;;  %p205_p8 = scmp.lt.s32.totalorder %s773_s12, 3 }
  0x16   : > { %p206_p9 = pnand %p581_p7, %p205_p8 }
  0x17   : > { %p243_p10 = scmp.lt.s32.totalorder (!%p206_p9), %s850_s2, 1  ;;  %s587_s9 = sshll.u32 (!%p206_p9), %s850_s2, 7 }
  0x18   : > { %209 = sbr.rel (%p206_p9) target bundleno = 806 (0x326), region = 32  ;;  %s261_s10 = sadd.s32 (!%p206_p9), 1, %s587_s9 }
  0x19   : > { %s891_s13 = sld [smem:[#allocation4 + %s587_s9]] (!%p206_p9) }
  0x1a   : > { %s893_s15 = sld [smem:[#allocation4 + %s261_s10]] (!%p206_p9) }
  0x1b   : > { %s258_s16 = sld [smem:[#allocation3 + %s850_s2]] (!%p206_p9) }
  0x1d   : > { %v777_v0 = vmov 0   ;;  %s244_s20 = scalar_select %p243_p10, %s850_s2, 1  ;;  %v778_v3 = vmov 1   ;;  %v255_v12 = vlaneseq  ;;  %v779_v49 = vmov 2866.0  }
  0x1e   : > { %647 = vset.pattern.permute.xlu1 %v777_v0  ;;  %645 = vset.pattern.permute.xlu0 %v777_v0 }
  0x1f   : > { %s584_s21 = sshll.u32 %s244_s20, 3  ;;  %s586_s28 = sshll.u32 %s244_s20, 2  ;;  %v329_v10 = vstv %s891_s13  ;;  %v902_v20 = vand.u32 127, %v255_v12 }
  0x20   : > { %s250_s24 = scalar_lea.vmem %s989_s4, %s584_s21  ;;  %s246_s27 = scalar_lea.vmem %s988_s3, %s584_s21  ;;  %v336_v13 = vstv %s893_s15 }
  0x21   : > { %v267_v1 = vld [vmem:[%s250_s24] sm:$0xff]  ;;  %s254_s8 = scalar_lea.vmem %s990_s5, %s586_s28  ;;  %v263_v22 = vstv %s258_s16  ;;  %s914_s20 = sand.u32 1, %s765_s1   ;;  %vm391_vm14 = vcmp.eq.s32.totalorder %v902_v20, 0 }
  0x22   : > { %325 = vperm.xlu0 %645, %v267_v1   ;;  %v266_v2 = vld [vmem:[%s246_s27] sm:$0xff]  ;;  %vm907_vm0 = vcmp.lt.s32.totalorder %v902_v20, %v263_v22  ;;  %s582_s21 = sshll.u32 %s914_s20, 3  ;;  %s343_s23 = smul.f32 100.0, %s893_s15 }
  0x23   : > { %270 = vperm.xlu1 %647, %v266_v2   ;;  %v889_v4 = vld [vmem:[%s254_s8] sm:$0xf]  ;;  %s919_s22 = scalar_lea.vmem [#allocation6], %s582_s21  ;;  %s257_s27 = sld [smem:[#allocation5]] }
  0x24   : > { %v273_v7 = vperm.slane %v889_v4, 0  ;;  %v279_v9 = vperm.slane %v889_v4, 1  ;;  %v342_v0 = vmul.f32 %v336_v13, %v889_v4  ;;  %s590_s28 = sshll.u32 %s850_s2, 3  ;;  %s445_s9 = sshll.u32 %s919_s22, 4  ;;  %s446_s9 = int_to_ptr.vmem [resolvable:$true] %s445_s9 }
  0x25   : > { %s443_s8 = scalar_lea.hbm %s991_s6, %s590_s28  ;;  %s428_s13 = scalar_lea.sflag [#allocation7], %s914_s20 }
  0x26   : > { %s447_s10 = sshll.u32 %s443_s8, 4  ;;  %s448_s10 = int_to_ptr.hbm [resolvable:$true] %s447_s10 }
  0x27   : > { %s691_s15 = sshra.s32 %s448_s10, 4  ;;  %s692_s15 = int_to_ptr.hbm [resolvable:$true] %s691_s15 }
  0x28   : > { %s693_s16 = scalar_lea.hbm %s692_s15, 8  ;;  %p698_p0 = scmp.lt.s32.totalorder %s692_s15, %s991_s6 }
  0x29   : > { %p694_p11 = scmp.ne.s32.totalorder %s692_s15, %s693_s16 }
  0x2a   : > { %646 = vset.pattern.permute.xlu0 %v778_v3 }
  0x2b   : > { %648 = vset.pattern.permute.xlu1 %v778_v3  ;;  %332 = vperm.xlu0 %646, %v267_v1   ;;  %v341_v1 = vmul.f32 %v329_v10, %v889_v4  ;;  %p695_p12 = pnand %p694_p11, %p867_p5 }
  0x2c   : > { %276 = vperm.xlu1 %648, %v266_v2   ;;  %v355_v2 = vmul.f32 %v342_v0, %v342_v0 }
  0x2d   : > { %v354_v3 = vmul.f32 %v341_v1, %v341_v1  ;;  %p696_p13 = pneg %p695_p12 }
  0x94   : > { %v326_v5 = vpop.permute.xlu0 %325 }
  0x95   : > { %v271_v6 = vpop.permute.xlu1 %270  ;;  %v328_v8 = vsub.f32 %v326_v5, %v273_v7  ;;  %v357_v5 = vrot.slane %v355_v2, 1 }
  0x96   : > { %v274_v11 = vsub.f32 %v271_v6, %v273_v7 }
  0x97   : > { %v330_v15 = vmul.f32 %v329_v10, %v328_v8  ;;  %v359_v6 = vadd.f32 %v357_v5, %v354_v3 }
  0x98   : > { %v281_v18 = vmul.f32 %v274_v11, %v274_v11 }
  0x99   : > { %v338_v24 = vmul.f32 %v330_v15, %v330_v15  ;;  %v360_v7 = vmul.f32 0.25, %v359_v6 }
  0x9d   : > { %v333_v14 = vpop.permute.xlu0 %332 }
  0x9e   : > { %v335_v16 = vsub.f32 %v333_v14, %v279_v9  ;;  %v277_v17 = vpop.permute.xlu1 %276 }
  0x9f   : > { %v280_v19 = vsub.f32 %v277_v17, %v279_v9 }
  0xa0   : > { %v337_v21 = vmul.f32 %v336_v13, %v335_v16 }
  0xa1   : > { %v282_v23 = vmul.f32 %v280_v19, %v280_v19 }
  0xa2   : > { %v339_v25 = vmul.f32 %v337_v21, %v337_v21 }
  0xa3   : > { %v283_v26 = vadd.f32 %v282_v23, %v281_v18  ;;  %v318_v18 = vstv %s257_s27 }
  0xa4   : > { %v340_v28 = vadd.f32 %v339_v25, %v338_v24 }
  0xa5   : > { %649 = vrsqrt.f32 %v283_v26  ;;  %vm291_vm1 = vcmp.eq.f32.partialorder %v283_v26, inf  ;;  %v294_v36 = vand.u32 2147483648, %v283_v26  ;;  %vm293_vm2 = vcmp.eq.f32.partialorder %v283_v26, 0.0 }
  0xa6   : > { %v363_v29 = vsel %vm907_vm0, %v340_v28, 1e+30  ;;  %651 = vrcp.f32 %v779_v49 }
  0xa7   : > { %364 = vmin.xlane.f32.xlu2 %v363_v29 }
  0xab   : > { %v650_v30 = vpop.eup %649 }
  0xac   : > { %v285_v31 = vmul.f32 %v650_v30, %v283_v26  ;;  %v652_v51 = vpop.eup %651 }
  0xad   : > { %v345_v52 = vmul.f32 2866.0, %v652_v51  ;;  %vm349_vm6 = vweird.f32 %v652_v51 }
  0xae   : > { %v286_v32 = vmul.f32 %v650_v30, %v285_v31 }
  0xaf   : > { %v346_v55 = vsub.f32 1.0, %v345_v52 }
  0xb0   : > { %v287_v33 = vmul.f32 0.5, %v286_v32 }
  0xb1   : > { %v347_v57 = vmul.f32 %v652_v51, %v346_v55 }
  0xb2   : > { %v288_v34 = vsub.f32 1.5, %v287_v33 }
  0xb3   : > { %v348_v58 = vadd.f32 %v652_v51, %v347_v57 }
  0xb4   : > { %v289_v35 = vmul.f32 %v650_v30, %v288_v34 }
  0xb5   : > { %v350_v59 = vsel %vm349_vm6, %v652_v51, %v348_v58 }
  0xb6   : > { %v290_v37 = vmul.f32 %v289_v35, %v283_v26  ;;  %594 = vpush %v350_v59 }
  0xb8   : > { %v292_v38 = vsel %vm291_vm1, %v283_v26, %v290_v37 }
  0xb9   : > { %v295_v39 = vsel %vm293_vm2, %v294_v36, %v292_v38 }
  0xba   : > { %v299_v40 = vsel %vm907_vm0, %v295_v39, 1e+30  ;;  %296 = vst [vmem:[%s919_s22] sm:$0xff] %v295_v39 }
  0xbb   : > { %300 = vmin.xlane.f32.xlu2 %v299_v40 }
  0xe7   : > { %s595_s24 = spop %594 }
  0xe8   : > { %s352_s25 = smul.f32 %s595_s24, %s343_s23  ;;  %s697_s24 = scalar_lea.hbm %s991_s6, 16 }
  0xe9   : > { %p699_p1 = scmp.lt.s32.totalorder %s697_s24, %s693_s16 }
  0xea   : > { %s353_s26 = smul.f32 %s352_s25, %s352_s25 }
  0xeb   : > { %p700_p2 = por %p699_p1, %p698_p0 }
  0xec   : > { %v361_v8 = vstv %s353_s26 }
  0xed   : > { %v362_v11 = vmax.f32 %v361_v8, %v360_v7  ;;  %p701_p3 = pnand %p700_p2, %p696_p13 }
  0xef   : > { %v383_v16 = vperm.slane %v362_v11, 2 }
 0x11a   : > { %v922_v41 = vpop.xlane.xlu2 %364 }
 0x11b   : > { %vm366_vm3 = vcmp.le.f32.partialorder %v363_v29, %v922_v41  ;;  %vm388_vm11 = vcmp.lt.f32.partialorder %v922_v41, 1e+30 }
 0x11c   : > { %v367_v42 = vsel %vm366_vm3, %v902_v20, 128 }
 0x11d   : > { %v369_v43 = vshra.s32 %v367_v42, 16  ;;  %v368_v50 = vand.u32 65535, %v367_v42 }
 0x11f   : > { %v371_v44 = vcvt.s32.f32 %v369_v43  ;;  %v370_v54 = vcvt.s32.f32 %v368_v50 }
 0x121   : > { %372 = vmin.xlane.f32.xlu1 %v371_v44 }
 0x12e   : > { %v301_v45 = vpop.xlane.xlu2 %300 }
 0x12f   : > { %vm302_vm4 = vcmp.le.f32.partialorder %v299_v40, %v301_v45  ;;  %vm319_vm9 = vcmp.le.f32.partialorder %v301_v45, %v318_v18  ;;  %vm320_vm10 = vcmp.lt.f32.partialorder %v301_v45, 1e+30 }
 0x130   : > { %v303_v46 = vsel %vm302_vm4, %v902_v20, 128  ;;  %vm321_vm13 = vmand %vm319_vm9, %vm320_vm10 }
 0x131   : > { %v305_v47 = vshra.s32 %v303_v46, 16  ;;  %v304_v60 = vand.u32 65535, %v303_v46 }
 0x133   : > { %v307_v48 = vcvt.s32.f32 %v305_v47  ;;  %v306_v62 = vcvt.s32.f32 %v304_v60 }
 0x135   : > { %308 = vmin.xlane.f32.xlu0 %v307_v48 }
 0x194   : > { %v373_v53 = vpop.xlane.xlu1 %372 }
 0x195   : > { %vm374_vm5 = vcmp.eq.f32.partialorder %v371_v44, %v373_v53  ;;  %v379_v9 = vcvt.f32.s32 %v373_v53 }
 0x196   : > { %v375_v56 = vsel %vm374_vm5, %v370_v54, inf }
 0x197   : > { %376 = vmin.xlane.f32.xlu2 %v375_v56  ;;  %v380_v14 = vshll.u32 %v379_v9, 16 }
 0x1a8   : > { %v309_v61 = vpop.xlane.xlu0 %308 }
 0x1a9   : > { %vm310_vm7 = vcmp.eq.f32.partialorder %v307_v48, %v309_v61  ;;  %v315_v17 = vcvt.f32.s32 %v309_v61 }
 0x1aa   : > { %v311_v63 = vsel %vm310_vm7, %v306_v62, inf }
 0x1ab   : > { %312 = vmin.xlane.f32.xlu2 %v311_v63  ;;  %v316_v21 = vshll.u32 %v315_v17, 16 }
 0x20a   : > { %v377_v12 = vpop.xlane.xlu2 %376 }
 0x20b   : > { %v378_v15 = vcvt.f32.s32 %v377_v12 }
 0x20d   : > { %v381_v13 = vadd.s32 %v380_v14, %v378_v15 }
 0x20f   : > { %vm382_vm8 = vcmp.eq.s32.totalorder %v902_v20, %v381_v13 }
 0x210   : > { %v384_v4 = vsel %vm382_vm8, %v383_v16, 1e+30 }
 0x211   : > { %385 = vmin.xlane.f32.xlu2 %v384_v4 }
 0x21e   : > { %v313_v10 = vpop.xlane.xlu2 %312 }
 0x21f   : > { %v314_v19 = vcvt.f32.s32 %v313_v10 }
 0x221   : > { %v317_v22 = vadd.s32 %v316_v21, %v314_v19 }
 0x223   : > { %v322_v25 = vsel %vm321_vm13, %v317_v22, 4294967295 }
 0x284   : > { %v386_v23 = vpop.xlane.xlu2 %385 }
 0x285   : > { %vm387_vm12 = vcmp.le.f32.partialorder %v922_v41, %v386_v23 }
 0x286   : > { %vm389_vm15 = vmand %vm387_vm12, %vm388_vm11 }
 0x287   : > { %v390_v24 = vsel %vm389_vm15, %v381_v13, 4294967295 }
 0x288   : > { %v392_v26 = vsel %vm391_vm14, %v322_v25, %v390_v24 }
 0x289   : > { %393 = vxpose.xlu2.b32.start.end [1/1] (short) (narrow) %v392_v26, 8 }
 0x28a   : > { %704 = shalt.err (!%p701_p3)
}
 0x28b   : > { %596 = dma.vmem_to_hbm [thread:$0]  (%p867_p5), %s446_s9, 128, %s448_s10, %s428_s13   ;;  %vm425_vm0 = vcmask 58368  }
 0x28c   : > { %s583_s22 = sshll.u32 %s914_s20, 1  ;;  %s591_s27 = sshll.u32 %s850_s2, 1 }
 0x28d   : > { %s457_s30 = scalar_lea.hbm %s992_s7, %s591_s27  ;;  %s242_s8 = scalar_lea.vmem [#allocation8], %s583_s22 }
 0x28e   : > { %s459_s21 = sshll.u32 %s242_s8, 4  ;;  %s461_s15 = sshll.u32 %s457_s30, 4  ;;  %s460_s21 = int_to_ptr.vmem [resolvable:$true] %s459_s21  ;;  %s462_s15 = int_to_ptr.hbm [resolvable:$true] %s461_s15 }
 0x28f   : > { %s433_s16 = scalar_lea.sflag [#allocation9], %s914_s20  ;;  %s719_s23 = sshra.s32 %s462_s15, 4  ;;  %s720_s23 = int_to_ptr.hbm [resolvable:$true] %s719_s23 }
 0x290   : > { %s721_s24 = scalar_lea.hbm %s720_s23, 2  ;;  %s725_s10 = scalar_lea.hbm %s992_s7, 4 }
 0x291   : > { %p722_p4 = scmp.ne.s32.totalorder %s720_s23, %s721_s24  ;;  %p726_p9 = scmp.lt.s32.totalorder %s720_s23, %s992_s7 }
 0x292   : > { %p727_p10 = scmp.lt.s32.totalorder %s725_s10, %s721_s24 }
 0x293   : > { %p723_p7 = pnand %p722_p4, %p867_p5 }
 0x294   : > { %p728_p11 = por %p727_p10, %p726_p9 }
 0x295   : > { %p724_p8 = pneg %p723_p7 }
 0x297   : > { %p729_p12 = pnand %p728_p11, %p724_p8 }
 0x322   : > { %v409_v20 = vpop.trf.xlu2 }
 0x323   : > { %426 = vst.msk [vmem:[%s242_s8] sm:$0x3] %vm425_vm0, %v409_v20 }
 0x324   : > { %732 = shalt.err (!%p729_p12)
}
 0x325   : > { %597 = dma.vmem_to_hbm [thread:$0]  (%p867_p5), %s460_s21, 32, %s462_s15, %s433_s16  }
 0x326 PF: > { %p607_p13 = scmp.ge.s32.totalorder %s773_s12, 2  ;;  %s473_s20 = sand.u32 1, %s761_s0  }
 0x327   : > { %s474_s26 = scalar_lea.sflag [#allocation7], %s473_s20 }
 0x328   : > { %p601_p0 = pnand %p607_p13, %p871_p6 }
 0x32a   : > { %p602_p1 = pneg %p601_p0 }
 0x32c   : > { %752 = dma.done.wait (%p602_p1), %s474_s26, 128  }
 0x32d   : > { %754 = vsyncadd (%p602_p1), %s474_s26, 4294967168  ;;  %s484_s22 = scalar_lea.sflag [#allocation9], %s473_s20 }
 0x32e   : > { %756 = dma.done.wait (%p602_p1), %s484_s22, 32  }
 0x32f   : > { %758 = vsyncadd (%p602_p1), %s484_s22, 4294967264  ;;  %p35_p5 = scmp.ge.s32.totalorder %s854_s14, 4   ;;  %s999_s0 = smov %s765_s1 }
 0x330   : > { %s1000_s1 = smov %s769_s11  ;;  %s1001_s11 = smov %s865_s17 }
 0x331   : > { %s1002_s12 = smov %s854_s14  ;;  %37 = sbr.rel (!%p35_p5) target bundleno = 13 (0xd), region = 90 }
 0x336   :  { %490 = vsyncpa [#allocation7], 1 }
 0x337   :  { %492 = vsyncpa [#allocation7 + $0x1], 1 }
 0x338   :  { %493 = vsyncpa [#allocation9], 1 }
 0x339   :  { %495 = vsyncpa [#allocation9 + $0x1], 1 }

</bundles_post_ra>
